<compile_context>
chip_gen: v7x
topology: tpu7x:2x2x1
jax: 0.10.0
libtpu: 0.0.40
codegen_flags: <defaults>
</compile_context>

<pallas_src>
import jax
import jax.numpy as jnp
from jax import lax
from jax.experimental import pallas as pl
from jax.experimental.pallas import tpu as pltpu


def fused_rnn_kernel(ids_ref, emb_ih_ref, whh_ref, b_ref, wc_ref, bc_ref, out_ref):
    """Fully fused, fully unrolled forward pass.

    ids_ref:    (B, S)   int32  raw token ids (batch-major, no wrapper prep)
    emb_ih_ref: (V, H)   f32    pre-folded  embedding @ W_ih
    whh_ref:    (H, H)   bf16   recurrent weight (pre-cast; single-pass MXU)
    b_ref:      (1, H)   f32    b_ih + b_hh
    wc_ref:     (H, C)   f32    classifier weight (classify.weight.T)
    bc_ref:     (1, C)   f32    classifier bias
    out_ref:    (B, S, C) f32   logits, already batch_first
    """
    B, S = ids_ref.shape
    V, H = emb_ih_ref.shape
    C = wc_ref.shape[-1]

    ids = ids_ref[...]          # (B, S) int32, single load
    emb_ih = emb_ih_ref[...]    # (V, H)
    whh_bf = whh_ref[...]       # (H, H) bf16
    b_row = b_ref[...]          # (1, H)
    wc = wc_ref[...]            # (H, C)
    bc = bc_ref[...]            # (1, C)

    iota_v = lax.broadcasted_iota(jnp.int32, (B, V), 1)   # hoisted, reused every step

    # --- Input projection for every step, OFF the serial dependency chain. ---
    # one_hot(ids[:, t]) @ (embedding @ W_ih) + b  -> (B, H), all independent of h.
    pre = []
    for t in range(S):
        oh_t = (ids[:, t:t + 1] == iota_v).astype(jnp.float32)              # (B, V)
        pre.append(jnp.dot(oh_t, emb_ih, preferred_element_type=jnp.float32) + b_row)

    # --- Serial recurrence: only the bf16 (h @ W_hh) + f32 tanh sit on the chain. ---
    # States stay in vregs (~1 vreg each); no VMEM scratch round-trips.
    h = jnp.tanh(pre[0])                       # h_{-1} == 0 -> skip the zero matmul
    hs = [h]
    for t in range(1, S):
        z = pre[t] + jnp.dot(h.astype(jnp.bfloat16), whh_bf,
                             preferred_element_type=jnp.float32)            # f32 acc
        h = jnp.tanh(z)                        # f32 tanh on the EUP
        hs.append(h)

    # --- Classifier + batch-major assembly (leaf work, overlaps with the recurrence). ---
    # Per batch row: gather its S hidden states into one (S, H) tile, one MXU matmul,
    # one aligned (S, C) store into the (B, S, C) output -> wrapper needs no transpose.
    for bb in range(B):
        hs_b = jnp.concatenate([hs[t][bb:bb + 1, :] for t in range(S)], axis=0)  # (S, H)
        out_ref[bb, :, :] = (
            jnp.dot(hs_b, wc, preferred_element_type=jnp.float32) + bc)          # (S, C)


def forward(token_ids, params):
    """token_ids: (B, S) int32 -> logits (B, S, C) float32 (PyTorch batch_first).

    Zero wrapper-side XLA ops: ids go in raw, the kernel output is already (B, S, C).
    """
    if token_ids.dtype != jnp.int32:
        token_ids = token_ids.astype(jnp.int32)
    B, S = token_ids.shape
    C = params["w_cls"].shape[-1]

    vmem = pl.BlockSpec(memory_space=pltpu.MemorySpace.VMEM)
    # NOTE: for large batches, grid over B with
    #   compiler_params=pltpu.CompilerParams(dimension_semantics=("parallel",))
    # to split work across v7x's two TensorCores; pointless at B=2.
    return pl.pallas_call(
        fused_rnn_kernel,
        out_shape=jax.ShapeDtypeStruct((B, S, C), jnp.float32),
        in_specs=[vmem] * 6,
        out_specs=vmem,
    )(token_ids, params["emb_ih"], params["w_hh_bf16"], params["b"],
      params["w_cls"], params["b_cls"])


def forward_ref(token_ids, params):
    """Pure-JAX f32 reference mirroring nn.Embedding + nn.RNN(batch_first) + nn.Linear."""
    x = jnp.take(params["embedding"], token_ids, axis=0)              # (B, S, D)
    B = token_ids.shape[0]
    H = params["w_hh"].shape[0]

    def step(h, x_t):
        h_new = jnp.tanh(x_t @ params["w_ih"] + h @ params["w_hh"] + params["b"])
        return h_new, h_new

    _, hs = lax.scan(step, jnp.zeros((B, H), jnp.float32),
                     jnp.transpose(x, (1, 0, 2)))                     # (S, B, H)
    hs = jnp.transpose(hs, (1, 0, 2))                                 # (B, S, H)
    return hs @ params["w_cls"] + params["b_cls"]


def init_params(key, vocab_size, vector_dim, hidden, sentence_length):
    ks = jax.random.split(key, 6)
    emb = jax.random.normal(ks[0], (vocab_size, vector_dim), jnp.float32) * 0.1
    emb = emb.at[0].set(0.0)  # padding_idx=0
    w_ih = jax.random.normal(ks[1], (vector_dim, hidden), jnp.float32) * 0.1
    w_hh = jax.random.normal(ks[2], (hidden, hidden), jnp.float32) * 0.1
    b_ih = jax.random.normal(ks[3], (hidden,), jnp.float32) * 0.1
    b_hh = jax.random.normal(ks[4], (hidden,), jnp.float32) * 0.1
    w_cls = jax.random.normal(ks[5], (hidden, sentence_length), jnp.float32) * 0.1
    b_cls = jnp.zeros((sentence_length,), jnp.float32)
    return {
        # f32 originals (used by the pure-JAX reference).
        "embedding": emb,
        "w_ih": w_ih,
        "w_hh": w_hh,
        # Kernel-side tensors, pre-folded / pre-cast ONCE at init (review items #1 and #2).
        "emb_ih": emb @ w_ih,                      # (V, H): embedding folded into W_ih
        "w_hh_bf16": w_hh.astype(jnp.bfloat16),    # bf16 MXU operand for the recurrence
        "b": (b_ih + b_hh)[None, :],               # (1, H)
        "w_cls": w_cls,                            # (H, C)
        "b_cls": b_cls[None, :],                   # (1, C)
    }


if __name__ == "__main__":
    key = jax.random.PRNGKey(0)

    # Small shapes consistent with the module.
    vocab_size = 20
    vector_dim = 32
    sentence_length = 8   # also the number of classes for classify
    hidden = 64
    batch = 2

    pkey, xkey = jax.random.split(key)
    params = init_params(pkey, vocab_size, vector_dim, hidden, sentence_length)

    token_ids = jax.random.randint(
        xkey, (batch, sentence_length), minval=0, maxval=vocab_size, dtype=jnp.int32
    )

    logits = jax.block_until_ready(forward(token_ids, params))
    ref = jax.block_until_ready(forward_ref(token_ids, params))

    assert logits.shape == (batch, sentence_length, sentence_length)
    assert logits.dtype == jnp.float32
    assert bool(jnp.allclose(logits, ref, rtol=1e-2, atol=1e-2)), "mismatch vs JAX reference"
    print("KERNEL_OK")
</pallas_src>

<mosaic_0001>
module attributes {stable_mosaic.version = 11 : i64} {
  func.func @fused_rnn_kernel(%arg0: memref<2x8xi32, #tpu.memory_space<vmem>>, %arg1: memref<20x64xf32, #tpu.memory_space<vmem>>, %arg2: memref<64x64xbf16, #tpu.memory_space<vmem>>, %arg3: memref<1x64xf32, #tpu.memory_space<vmem>>, %arg4: memref<64x8xf32, #tpu.memory_space<vmem>>, %arg5: memref<1x8xf32, #tpu.memory_space<vmem>>, %arg6: memref<2x8x8xf32, #tpu.memory_space<vmem>>) attributes {dimension_semantics = [], scalar_prefetch = 0 : i64, scratch_operands = 0 : i64, tpu.core_type = #tpu.core_type<tc>} {
    %c0 = arith.constant 0 : index
    %c0_0 = arith.constant 0 : index
    %0 = vector.load %arg0[%c0, %c0_0] : memref<2x8xi32, #tpu.memory_space<vmem>>, vector<2x8xi32>
    %c0_1 = arith.constant 0 : index
    %c0_2 = arith.constant 0 : index
    %1 = vector.load %arg1[%c0_1, %c0_2] : memref<20x64xf32, #tpu.memory_space<vmem>>, vector<20x64xf32>
    %c0_3 = arith.constant 0 : index
    %c0_4 = arith.constant 0 : index
    %2 = vector.load %arg2[%c0_3, %c0_4] : memref<64x64xbf16, #tpu.memory_space<vmem>>, vector<64x64xbf16>
    %c0_5 = arith.constant 0 : index
    %c0_6 = arith.constant 0 : index
    %3 = vector.load %arg3[%c0_5, %c0_6] : memref<1x64xf32, #tpu.memory_space<vmem>>, vector<1x64xf32>
    %c0_7 = arith.constant 0 : index
    %c0_8 = arith.constant 0 : index
    %4 = vector.load %arg4[%c0_7, %c0_8] : memref<64x8xf32, #tpu.memory_space<vmem>>, vector<64x8xf32>
    %c0_9 = arith.constant 0 : index
    %c0_10 = arith.constant 0 : index
    %5 = vector.load %arg5[%c0_9, %c0_10] : memref<1x8xf32, #tpu.memory_space<vmem>>, vector<1x8xf32>
    %6 = tpu.iota {dimensions = array<i32: 1>} : vector<2x20xi32>
    %7 = vector.extract_strided_slice %0 {offsets = [0, 0], sizes = [2, 1], strides = [1, 1]} : vector<2x8xi32> to vector<2x1xi32>
    %8 = vector.broadcast %7 : vector<2x1xi32> to vector<2x20xi32>
    %9 = arith.cmpi eq, %8, %6 : vector<2x20xi32>
    %10 = arith.extui %9 : vector<2x20xi1> to vector<2x20xi32>
    %11 = arith.sitofp %10 : vector<2x20xi32> to vector<2x20xf32>
    %cst = arith.constant dense<0.000000e+00> : vector<2x64xf32>
    %12 = tpu.matmul %11, %1, %cst {dimension_numbers = #tpu.dot_dimension_numbers<[1], [0], [0], [1], [0, 0, 1, 1], [], []>} : vector<2x20xf32>, vector<20x64xf32>, vector<2x64xf32> -> vector<2x64xf32>
    %13 = vector.broadcast %3 : vector<1x64xf32> to vector<2x64xf32>
    %14 = arith.addf %12, %13 : vector<2x64xf32>
    %15 = vector.extract_strided_slice %0 {offsets = [0, 1], sizes = [2, 1], strides = [1, 1]} : vector<2x8xi32> to vector<2x1xi32>
    %16 = vector.broadcast %15 : vector<2x1xi32> to vector<2x20xi32>
    %17 = arith.cmpi eq, %16, %6 : vector<2x20xi32>
    %18 = arith.extui %17 : vector<2x20xi1> to vector<2x20xi32>
    %19 = arith.sitofp %18 : vector<2x20xi32> to vector<2x20xf32>
    %cst_11 = arith.constant dense<0.000000e+00> : vector<2x64xf32>
    %20 = tpu.matmul %19, %1, %cst_11 {dimension_numbers = #tpu.dot_dimension_numbers<[1], [0], [0], [1], [0, 0, 1, 1], [], []>} : vector<2x20xf32>, vector<20x64xf32>, vector<2x64xf32> -> vector<2x64xf32>
    %21 = vector.broadcast %3 : vector<1x64xf32> to vector<2x64xf32>
    %22 = arith.addf %20, %21 : vector<2x64xf32>
    %23 = vector.extract_strided_slice %0 {offsets = [0, 2], sizes = [2, 1], strides = [1, 1]} : vector<2x8xi32> to vector<2x1xi32>
    %24 = vector.broadcast %23 : vector<2x1xi32> to vector<2x20xi32>
    %25 = arith.cmpi eq, %24, %6 : vector<2x20xi32>
    %26 = arith.extui %25 : vector<2x20xi1> to vector<2x20xi32>
    %27 = arith.sitofp %26 : vector<2x20xi32> to vector<2x20xf32>
    %cst_12 = arith.constant dense<0.000000e+00> : vector<2x64xf32>
    %28 = tpu.matmul %27, %1, %cst_12 {dimension_numbers = #tpu.dot_dimension_numbers<[1], [0], [0], [1], [0, 0, 1, 1], [], []>} : vector<2x20xf32>, vector<20x64xf32>, vector<2x64xf32> -> vector<2x64xf32>
    %29 = vector.broadcast %3 : vector<1x64xf32> to vector<2x64xf32>
    %30 = arith.addf %28, %29 : vector<2x64xf32>
    %31 = vector.extract_strided_slice %0 {offsets = [0, 3], sizes = [2, 1], strides = [1, 1]} : vector<2x8xi32> to vector<2x1xi32>
    %32 = vector.broadcast %31 : vector<2x1xi32> to vector<2x20xi32>
    %33 = arith.cmpi eq, %32, %6 : vector<2x20xi32>
    %34 = arith.extui %33 : vector<2x20xi1> to vector<2x20xi32>
    %35 = arith.sitofp %34 : vector<2x20xi32> to vector<2x20xf32>
    %cst_13 = arith.constant dense<0.000000e+00> : vector<2x64xf32>
    %36 = tpu.matmul %35, %1, %cst_13 {dimension_numbers = #tpu.dot_dimension_numbers<[1], [0], [0], [1], [0, 0, 1, 1], [], []>} : vector<2x20xf32>, vector<20x64xf32>, vector<2x64xf32> -> vector<2x64xf32>
    %37 = vector.broadcast %3 : vector<1x64xf32> to vector<2x64xf32>
    %38 = arith.addf %36, %37 : vector<2x64xf32>
    %39 = vector.extract_strided_slice %0 {offsets = [0, 4], sizes = [2, 1], strides = [1, 1]} : vector<2x8xi32> to vector<2x1xi32>
    %40 = vector.broadcast %39 : vector<2x1xi32> to vector<2x20xi32>
    %41 = arith.cmpi eq, %40, %6 : vector<2x20xi32>
    %42 = arith.extui %41 : vector<2x20xi1> to vector<2x20xi32>
    %43 = arith.sitofp %42 : vector<2x20xi32> to vector<2x20xf32>
    %cst_14 = arith.constant dense<0.000000e+00> : vector<2x64xf32>
    %44 = tpu.matmul %43, %1, %cst_14 {dimension_numbers = #tpu.dot_dimension_numbers<[1], [0], [0], [1], [0, 0, 1, 1], [], []>} : vector<2x20xf32>, vector<20x64xf32>, vector<2x64xf32> -> vector<2x64xf32>
    %45 = vector.broadcast %3 : vector<1x64xf32> to vector<2x64xf32>
    %46 = arith.addf %44, %45 : vector<2x64xf32>
    %47 = vector.extract_strided_slice %0 {offsets = [0, 5], sizes = [2, 1], strides = [1, 1]} : vector<2x8xi32> to vector<2x1xi32>
    %48 = vector.broadcast %47 : vector<2x1xi32> to vector<2x20xi32>
    %49 = arith.cmpi eq, %48, %6 : vector<2x20xi32>
    %50 = arith.extui %49 : vector<2x20xi1> to vector<2x20xi32>
    %51 = arith.sitofp %50 : vector<2x20xi32> to vector<2x20xf32>
    %cst_15 = arith.constant dense<0.000000e+00> : vector<2x64xf32>
    %52 = tpu.matmul %51, %1, %cst_15 {dimension_numbers = #tpu.dot_dimension_numbers<[1], [0], [0], [1], [0, 0, 1, 1], [], []>} : vector<2x20xf32>, vector<20x64xf32>, vector<2x64xf32> -> vector<2x64xf32>
    %53 = vector.broadcast %3 : vector<1x64xf32> to vector<2x64xf32>
    %54 = arith.addf %52, %53 : vector<2x64xf32>
    %55 = vector.extract_strided_slice %0 {offsets = [0, 6], sizes = [2, 1], strides = [1, 1]} : vector<2x8xi32> to vector<2x1xi32>
    %56 = vector.broadcast %55 : vector<2x1xi32> to vector<2x20xi32>
    %57 = arith.cmpi eq, %56, %6 : vector<2x20xi32>
    %58 = arith.extui %57 : vector<2x20xi1> to vector<2x20xi32>
    %59 = arith.sitofp %58 : vector<2x20xi32> to vector<2x20xf32>
    %cst_16 = arith.constant dense<0.000000e+00> : vector<2x64xf32>
    %60 = tpu.matmul %59, %1, %cst_16 {dimension_numbers = #tpu.dot_dimension_numbers<[1], [0], [0], [1], [0, 0, 1, 1], [], []>} : vector<2x20xf32>, vector<20x64xf32>, vector<2x64xf32> -> vector<2x64xf32>
    %61 = vector.broadcast %3 : vector<1x64xf32> to vector<2x64xf32>
    %62 = arith.addf %60, %61 : vector<2x64xf32>
    %63 = vector.extract_strided_slice %0 {offsets = [0, 7], sizes = [2, 1], strides = [1, 1]} : vector<2x8xi32> to vector<2x1xi32>
    %64 = vector.broadcast %63 : vector<2x1xi32> to vector<2x20xi32>
    %65 = arith.cmpi eq, %64, %6 : vector<2x20xi32>
    %66 = arith.extui %65 : vector<2x20xi1> to vector<2x20xi32>
    %67 = arith.sitofp %66 : vector<2x20xi32> to vector<2x20xf32>
    %cst_17 = arith.constant dense<0.000000e+00> : vector<2x64xf32>
    %68 = tpu.matmul %67, %1, %cst_17 {dimension_numbers = #tpu.dot_dimension_numbers<[1], [0], [0], [1], [0, 0, 1, 1], [], []>} : vector<2x20xf32>, vector<20x64xf32>, vector<2x64xf32> -> vector<2x64xf32>
    %69 = vector.broadcast %3 : vector<1x64xf32> to vector<2x64xf32>
    %70 = arith.addf %68, %69 : vector<2x64xf32>
    %71 = math.tanh %14 : vector<2x64xf32>
    %72 = arith.truncf %71 : vector<2x64xf32> to vector<2x64xbf16>
    %cst_18 = arith.constant dense<0.000000e+00> : vector<2x64xf32>
    %73 = tpu.matmul %72, %2, %cst_18 {dimension_numbers = #tpu.dot_dimension_numbers<[1], [0], [0], [1], [0, 0, 1, 1], [], []>} : vector<2x64xbf16>, vector<64x64xbf16>, vector<2x64xf32> -> vector<2x64xf32>
    %74 = arith.addf %22, %73 : vector<2x64xf32>
    %75 = math.tanh %74 : vector<2x64xf32>
    %76 = arith.truncf %75 : vector<2x64xf32> to vector<2x64xbf16>
    %cst_19 = arith.constant dense<0.000000e+00> : vector<2x64xf32>
    %77 = tpu.matmul %76, %2, %cst_19 {dimension_numbers = #tpu.dot_dimension_numbers<[1], [0], [0], [1], [0, 0, 1, 1], [], []>} : vector<2x64xbf16>, vector<64x64xbf16>, vector<2x64xf32> -> vector<2x64xf32>
    %78 = arith.addf %30, %77 : vector<2x64xf32>
    %79 = math.tanh %78 : vector<2x64xf32>
    %80 = arith.truncf %79 : vector<2x64xf32> to vector<2x64xbf16>
    %cst_20 = arith.constant dense<0.000000e+00> : vector<2x64xf32>
    %81 = tpu.matmul %80, %2, %cst_20 {dimension_numbers = #tpu.dot_dimension_numbers<[1], [0], [0], [1], [0, 0, 1, 1], [], []>} : vector<2x64xbf16>, vector<64x64xbf16>, vector<2x64xf32> -> vector<2x64xf32>
    %82 = arith.addf %38, %81 : vector<2x64xf32>
    %83 = math.tanh %82 : vector<2x64xf32>
    %84 = arith.truncf %83 : vector<2x64xf32> to vector<2x64xbf16>
    %cst_21 = arith.constant dense<0.000000e+00> : vector<2x64xf32>
    %85 = tpu.matmul %84, %2, %cst_21 {dimension_numbers = #tpu.dot_dimension_numbers<[1], [0], [0], [1], [0, 0, 1, 1], [], []>} : vector<2x64xbf16>, vector<64x64xbf16>, vector<2x64xf32> -> vector<2x64xf32>
    %86 = arith.addf %46, %85 : vector<2x64xf32>
    %87 = math.tanh %86 : vector<2x64xf32>
    %88 = arith.truncf %87 : vector<2x64xf32> to vector<2x64xbf16>
    %cst_22 = arith.constant dense<0.000000e+00> : vector<2x64xf32>
    %89 = tpu.matmul %88, %2, %cst_22 {dimension_numbers = #tpu.dot_dimension_numbers<[1], [0], [0], [1], [0, 0, 1, 1], [], []>} : vector<2x64xbf16>, vector<64x64xbf16>, vector<2x64xf32> -> vector<2x64xf32>
    %90 = arith.addf %54, %89 : vector<2x64xf32>
    %91 = math.tanh %90 : vector<2x64xf32>
    %92 = arith.truncf %91 : vector<2x64xf32> to vector<2x64xbf16>
    %cst_23 = arith.constant dense<0.000000e+00> : vector<2x64xf32>
    %93 = tpu.matmul %92, %2, %cst_23 {dimension_numbers = #tpu.dot_dimension_numbers<[1], [0], [0], [1], [0, 0, 1, 1], [], []>} : vector<2x64xbf16>, vector<64x64xbf16>, vector<2x64xf32> -> vector<2x64xf32>
    %94 = arith.addf %62, %93 : vector<2x64xf32>
    %95 = math.tanh %94 : vector<2x64xf32>
    %96 = arith.truncf %95 : vector<2x64xf32> to vector<2x64xbf16>
    %cst_24 = arith.constant dense<0.000000e+00> : vector<2x64xf32>
    %97 = tpu.matmul %96, %2, %cst_24 {dimension_numbers = #tpu.dot_dimension_numbers<[1], [0], [0], [1], [0, 0, 1, 1], [], []>} : vector<2x64xbf16>, vector<64x64xbf16>, vector<2x64xf32> -> vector<2x64xf32>
    %98 = arith.addf %70, %97 : vector<2x64xf32>
    %99 = math.tanh %98 : vector<2x64xf32>
    %100 = vector.extract_strided_slice %71 {offsets = [0, 0], sizes = [1, 64], strides = [1, 1]} : vector<2x64xf32> to vector<1x64xf32>
    %101 = vector.extract_strided_slice %75 {offsets = [0, 0], sizes = [1, 64], strides = [1, 1]} : vector<2x64xf32> to vector<1x64xf32>
    %102 = vector.extract_strided_slice %79 {offsets = [0, 0], sizes = [1, 64], strides = [1, 1]} : vector<2x64xf32> to vector<1x64xf32>
    %103 = vector.extract_strided_slice %83 {offsets = [0, 0], sizes = [1, 64], strides = [1, 1]} : vector<2x64xf32> to vector<1x64xf32>
    %104 = vector.extract_strided_slice %87 {offsets = [0, 0], sizes = [1, 64], strides = [1, 1]} : vector<2x64xf32> to vector<1x64xf32>
    %105 = vector.extract_strided_slice %91 {offsets = [0, 0], sizes = [1, 64], strides = [1, 1]} : vector<2x64xf32> to vector<1x64xf32>
    %106 = vector.extract_strided_slice %95 {offsets = [0, 0], sizes = [1, 64], strides = [1, 1]} : vector<2x64xf32> to vector<1x64xf32>
    %107 = vector.extract_strided_slice %99 {offsets = [0, 0], sizes = [1, 64], strides = [1, 1]} : vector<2x64xf32> to vector<1x64xf32>
    %108 = tpu.concatenate %100, %101, %102, %103, %104, %105, %106, %107 in 0 : vector<1x64xf32>, vector<1x64xf32>, vector<1x64xf32>, vector<1x64xf32>, vector<1x64xf32>, vector<1x64xf32>, vector<1x64xf32>, vector<1x64xf32> -> vector<8x64xf32>
    %cst_25 = arith.constant dense<0.000000e+00> : vector<8x8xf32>
    %109 = tpu.matmul %108, %4, %cst_25 {dimension_numbers = #tpu.dot_dimension_numbers<[1], [0], [0], [1], [0, 0, 1, 1], [], []>} : vector<8x64xf32>, vector<64x8xf32>, vector<8x8xf32> -> vector<8x8xf32>
    %110 = vector.broadcast %5 : vector<1x8xf32> to vector<8x8xf32>
    %111 = arith.addf %109, %110 : vector<8x8xf32>
    %c0_26 = arith.constant 0 : index
    %c0_27 = arith.constant 0 : index
    %c0_28 = arith.constant 0 : index
    %112 = vector.load %arg6[%c0_26, %c0_27, %c0_28] : memref<2x8x8xf32, #tpu.memory_space<vmem>>, vector<1x8x8xf32>
    %113 = vector.shape_cast %112 : vector<1x8x8xf32> to vector<8x8xf32>
    %114 = vector.shape_cast %111 : vector<8x8xf32> to vector<1x8x8xf32>
    tpu.vector_store %arg6[%c0_26, %c0_27, %c0_28], %114 {strides = array<i32>} : memref<2x8x8xf32, #tpu.memory_space<vmem>>, vector<1x8x8xf32>,
    %115 = vector.extract_strided_slice %71 {offsets = [1, 0], sizes = [1, 64], strides = [1, 1]} : vector<2x64xf32> to vector<1x64xf32>
    %116 = vector.extract_strided_slice %75 {offsets = [1, 0], sizes = [1, 64], strides = [1, 1]} : vector<2x64xf32> to vector<1x64xf32>
    %117 = vector.extract_strided_slice %79 {offsets = [1, 0], sizes = [1, 64], strides = [1, 1]} : vector<2x64xf32> to vector<1x64xf32>
    %118 = vector.extract_strided_slice %83 {offsets = [1, 0], sizes = [1, 64], strides = [1, 1]} : vector<2x64xf32> to vector<1x64xf32>
    %119 = vector.extract_strided_slice %87 {offsets = [1, 0], sizes = [1, 64], strides = [1, 1]} : vector<2x64xf32> to vector<1x64xf32>
    %120 = vector.extract_strided_slice %91 {offsets = [1, 0], sizes = [1, 64], strides = [1, 1]} : vector<2x64xf32> to vector<1x64xf32>
    %121 = vector.extract_strided_slice %95 {offsets = [1, 0], sizes = [1, 64], strides = [1, 1]} : vector<2x64xf32> to vector<1x64xf32>
    %122 = vector.extract_strided_slice %99 {offsets = [1, 0], sizes = [1, 64], strides = [1, 1]} : vector<2x64xf32> to vector<1x64xf32>
    %123 = tpu.concatenate %115, %116, %117, %118, %119, %120, %121, %122 in 0 : vector<1x64xf32>, vector<1x64xf32>, vector<1x64xf32>, vector<1x64xf32>, vector<1x64xf32>, vector<1x64xf32>, vector<1x64xf32>, vector<1x64xf32> -> vector<8x64xf32>
    %cst_29 = arith.constant dense<0.000000e+00> : vector<8x8xf32>
    %124 = tpu.matmul %123, %4, %cst_29 {dimension_numbers = #tpu.dot_dimension_numbers<[1], [0], [0], [1], [0, 0, 1, 1], [], []>} : vector<8x64xf32>, vector<64x8xf32>, vector<8x8xf32> -> vector<8x8xf32>
    %125 = vector.broadcast %5 : vector<1x8xf32> to vector<8x8xf32>
    %126 = arith.addf %124, %125 : vector<8x8xf32>
    %c1 = arith.constant 1 : index
    %c0_30 = arith.constant 0 : index
    %c0_31 = arith.constant 0 : index
    %127 = vector.load %arg6[%c1, %c0_30, %c0_31] : memref<2x8x8xf32, #tpu.memory_space<vmem>>, vector<1x8x8xf32>
    %128 = vector.shape_cast %127 : vector<1x8x8xf32> to vector<8x8xf32>
    %129 = vector.shape_cast %126 : vector<8x8xf32> to vector<1x8x8xf32>
    tpu.vector_store %arg6[%c1, %c0_30, %c0_31], %129 {strides = array<i32>} : memref<2x8x8xf32, #tpu.memory_space<vmem>>, vector<1x8x8xf32>,
    return
  }
}

</mosaic_0001>

<bundles_post_ra>
// kernel: tpu_custom_call.1
= control target key start
LH: loop header
LB: loop body
LE: loop exit
PB: predicated region body
PF: predicated region fallthrough
CT: control target
= control target key end

     0   :  { %v1701_v3 = vmov 0   ;;  %v1702_v4 = vmov 0.0|0.0   ;;  %vm1703_vm0 = vmmov 0   ;;  %v1704_v7 = vmov 0.0   ;;  %s2044_s0 = inlined_call_operand.vmem [shape: s32[2,8], index: 0, kind: input, shape index: {}]   ;;  %s2045_s1 = inlined_call_operand.vmem [shape: f32[20,64], index: 1, kind: input, shape index: {}]   ;;  %s2046_s2 = inlined_call_operand.vmem [shape: bf16[64,64], index: 2, kind: input, shape index: {}]   ;;  %s2047_s3 = inlined_call_operand.vmem [shape: f32[1,64], index: 3, kind: input, shape index: {}]   ;;  %s2048_s4 = inlined_call_operand.vmem [shape: f32[64,8], index: 4, kind: input, shape index: {}]   ;;  %s2049_s5 = inlined_call_operand.vmem [shape: f32[1,8], index: 5, kind: input, shape index: {}]   ;;  %s2050_s6 = inlined_call_operand.hbm [shape: f32[2,8,8], index: 6, kind: output, shape index: {}]  }
   0x1   :  { %v1753_v0 = vld [vmem:[%s2044_s0] sm:$0x3]  ;;  %v27_v2 = vld [vmem:[%s2045_s1 + $0x8] sm:$0xff]  ;;  %1648 = vset.pattern.permute.xlu0 %v1701_v3  ;;  %1586 = vmatprep.subr.bf16.mxu1 %v1702_v4  ;;  %v1770_v6 = vld [vmem:[%s2045_s1 + $0x10] sm:$0xf]  ;;  %vm65_vm1 = vcmask 1043456  }
   0x2   :  { %v26_v1 = vld [vmem:[%s2045_s1] sm:$0xff]  ;;  %50 = vperm.xlu0 %1648, %v1753_v0   ;;  %1592 = vmatprep.subr.bf16.mxu0 %v1702_v4  ;;  %v1705_v8 = vmov 4   ;;  %v1706_v9 = vmov 2  }
   0x3   :  { %v1762_v5 = vpack.c.bf16 %v27_v2, %v26_v1  ;;  %1398 = vmatprep.mubr.msk.f32.mxu1 %vm1703_vm0, %v1704_v7  ;;  %1650 = vset.pattern.permute.xlu1 %v1705_v8 }
   0x4   :  { %377 = vperm.xlu1 %1650, %v1753_v0  }
   0x5   :  { %1588 = vmatpush3.bf16.msra.mxu1 %v1762_v5  ;;  %1594 = vmatpush3.bf16.msra.mxu0 %v1762_v5 }
   0x6   :  { %1396 = vmatprep.subr.mxu1 %v1704_v7  ;;  %1414 = vmatprep.subr.mxu0 %v1704_v7 }
   0x7   :  { %1649 = vset.pattern.permute.xlu0 %v1706_v9 }
   0x8   :  { %11 = vsyncpa [#allocation3], 0  ;;  %219 = vperm.xlu0 %1649, %v1753_v0   ;;  %1416 = vmatprep.mubr.msk.f32.mxu0 %vm1703_vm0, %v1704_v7  ;;  %v1707_v10 = vmov 6   ;;  %v1708_v11 = vmov 1   ;;  %v47_v12 = vlaneseq  ;;  %vm61_vm2 = vcmask 162816   ;;  %v1829_v22 = vld [vmem:[%s2046_s2] sm:$0xff]  }
   0x9   :  { %1397 = vmatpush3.msk.msra.mxu1 %vm65_vm1, %v1770_v6  ;;  %1415 = vmatpush3.msk.msra.mxu0 %vm65_vm1, %v1770_v6  ;;  %v1836_v23 = vld [vmem:[%s2046_s2 + $0x8] sm:$0xff]   ;;  %v1843_v25 = vld [vmem:[%s2046_s2 + $0x10] sm:$0xff]   ;;  %v1856_v27 = vld [vmem:[%s2046_s2 + $0x18] sm:$0xff]   ;;  %v1709_v28 = vmov 3   ;;  %v1710_v29 = vmov 5   ;;  %v1711_v30 = vmov 7  }
   0xa   :  { %1598 = vmatprep.subr.bf16.mxu0 %v1702_v4  ;;  %1589 = vmatprep.subr.bf16.mxu1 %v1702_v4  ;;  %v1789_v13 = vand.u32 127, %v47_v12  ;;  %v1870_v31 = vld [vmem:[%s2047_s3] ss:$0 sm:$0xff]  ;;  %vm718_vm8 = vcmask 523264   ;;  %vm1061_vm12 = vcmask 1040384   ;;  %vm1063_vm13 = vcmask 1041408  }
   0xb   :  { %1651 = vset.pattern.permute.xlu1 %v1707_v10  ;;  %vm1065_vm14 = vcmask 1042432   ;;  %vm1068_vm15 = vcmask 1044480  }
   0xc   :  { %535 = vperm.xlu1 %1651, %v1753_v0   ;;  %1653 = vset.pattern.permute.xlu0 %v1709_v28 }
   0xd   :  { %298 = vperm.xlu0 %1653, %v1753_v0  }
  0x10   :  { %1652 = vset.pattern.permute.xlu1 %v1708_v11 }
  0x11   :  { %140 = vperm.xlu1 %1652, %v1753_v0   ;;  %1656 = vset.pattern.permute.xlu0 %v1711_v30 }
  0x15   :  { %1654 = vset.pattern.permute.xlu1 %v1710_v29 }
  0x16   :  { %456 = vperm.xlu1 %1654, %v1753_v0  }
  0x1a   :  { %1655 = vset.pattern.permute.xlu1 %v1711_v30 }
  0x1b   :  { %614 = vperm.xlu1 %1655, %v1753_v0  }
  0x81   :  { %v51_v14 = vpop.permute.xlu0 %50 }
  0x82   :  { %vm52_vm3 = vcmp.eq.s32.totalorder %v51_v14, %v1789_v13 }
  0x83   :  { %v1268_v15 = vsel %vm52_vm3, 1.0, %v1704_v7  ;;  %v378_v17 = vpop.permute.xlu1 %377 }
  0x84   :  { %1399 = vmatmul.mubr.msk.f32.vlgmr.msra.gmra.mrb[0].mxu1 %vm61_vm2, %v1268_v15  ;;  %vm379_vm5 = vcmp.eq.s32.totalorder %v378_v17, %v1789_v13 }
  0x85   :  { %1591 = vmatpush3.bf16.msra.mxu1 %v1762_v5  ;;  %1407 = vmatprep.mubr.msk.f32.mxu1 %vm1703_vm0, %v1704_v7  ;;  %v1281_v19 = vsel %vm379_vm5, 1.0, %v1704_v7 }
  0x86   :  { %1405 = vmatprep.subr.mxu1 %v1704_v7 }
  0x87   :  { %v220_v16 = vpop.permute.xlu0 %219 }
  0x88   :  { %vm221_vm4 = vcmp.eq.s32.totalorder %v220_v16, %v1789_v13 }
  0x89   :  { %v1275_v18 = vsel %vm221_vm4, 1.0, %v1704_v7  ;;  %1406 = vmatpush3.msk.msra.mxu1 %vm65_vm1, %v1770_v6 }
  0x8a   :  { %1417 = vmatmul.mubr.msk.f32.vlgmr.msra.gmra.mrb[0].mxu0 %vm61_vm2, %v1275_v18  ;;  %1595 = vmatprep.subr.bf16.mxu1 %v1702_v4 }
  0x8b   :  { %1600 = vmatpush3.bf16.msra.mxu0 %v1762_v5  ;;  %1434 = vmatprep.mubr.msk.f32.mxu0 %vm1703_vm0, %v1704_v7  ;;  %v536_v20 = vpop.permute.xlu1 %535 }
  0x8c   :  { %1432 = vmatprep.subr.mxu0 %v1704_v7  ;;  %vm537_vm6 = vcmp.eq.s32.totalorder %v536_v20, %v1789_v13  ;;  %v299_v42 = vpop.permute.xlu0 %298 }
  0x8d   :  { %v1287_v21 = vsel %vm537_vm6, 1.0, %v1704_v7  ;;  %vm300_vm9 = vcmp.eq.s32.totalorder %v299_v42, %v1789_v13 }
  0x8e   :  { %v1278_v45 = vsel %vm300_vm9, 1.0, %v1704_v7 }
  0x8f   :  { %1433 = vmatpush3.msk.msra.mxu0 %vm65_vm1, %v1770_v6 }
  0x90   :  { %1435 = vmatmul.mubr.msk.f32.vlgmr.msra.gmra.mrb[2].mxu0 %vm61_vm2, %v1281_v19  ;;  %1604 = vmatprep.subr.bf16.mxu0 %v1702_v4  ;;  %v141_v24 = vpop.permute.xlu1 %140 }
  0x91   :  { %1606 = vmatpush3.bf16.msra.mxu0 %v1762_v5  ;;  %1452 = vmatprep.mubr.msk.f32.mxu0 %vm1703_vm0, %v1704_v7  ;;  %vm142_vm7 = vcmp.eq.s32.totalorder %v141_v24, %v1789_v13 }
  0x92   :  { %1450 = vmatprep.subr.mxu0 %v1704_v7  ;;  %v1272_v26 = vsel %vm142_vm7, 1.0, %v1704_v7 }
  0x93   :  { %1408 = vmatmul.mubr.msk.f32.vlgmr.msra.gmra.mrb[2].mxu1 %vm61_vm2, %v1272_v26 }
  0x94   :  { %1597 = vmatpush3.bf16.msra.mxu1 %v1762_v5  ;;  %1425 = vmatprep.mubr.msk.f32.mxu1 %vm1703_vm0, %v1704_v7 }
  0x95   :  { %1451 = vmatpush3.msk.msra.mxu0 %vm65_vm1, %v1770_v6  ;;  %1423 = vmatprep.subr.mxu1 %v1704_v7  ;;  %v457_v44 = vpop.permute.xlu1 %456 }
  0x96   :  { %1453 = vmatmul.mubr.msk.f32.vlgmr.msra.gmra.mrb[4].mxu0 %vm61_vm2, %v1287_v21  ;;  %1464 = vmatprep.subr.bf16.mxu0 %v1704_v7  ;;  %vm458_vm10 = vcmp.eq.s32.totalorder %v457_v44, %v1789_v13 }
  0x97   :  { %1472 = vmatprep.mubr.msk.bf16.mxu0 %vm1703_vm0, %v1704_v7  ;;  %1465 = vmatpush3.bf16.msra.mxu0 %v1829_v22  ;;  %v1284_v46 = vsel %vm458_vm10, 1.0, %v1704_v7 }
  0x98   :  { %1466 = vmatprep.subr.bf16.mxu0 %v1704_v7  ;;  %1424 = vmatpush3.msk.msra.mxu1 %vm65_vm1, %v1770_v6 }
  0x99   :  { %1601 = vmatprep.subr.bf16.mxu1 %v1702_v4  ;;  %1426 = vmatmul.mubr.msk.f32.vlgmr.msra.gmra.mrb[4].mxu1 %vm61_vm2, %v1278_v45 }
  0x9a   :  { %1603 = vmatpush3.bf16.msra.mxu1 %v1762_v5  ;;  %1443 = vmatprep.mubr.msk.f32.mxu1 %vm1703_vm0, %v1704_v7  ;;  %v615_v47 = vpop.permute.xlu1 %614 }
  0x9b   :  { %1467 = vmatpush3.bf16.msra.mxu0 %v1836_v23  ;;  %1441 = vmatprep.subr.mxu1 %v1704_v7  ;;  %vm616_vm11 = vcmp.eq.s32.totalorder %v615_v47, %v1789_v13 }
  0x9c   :  { %1468 = vmatprep.subr.bf16.mxu0 %v1704_v7  ;;  %v1290_v48 = vsel %vm616_vm11, 1.0, %v1704_v7 }
  0x9e   :  { %1442 = vmatpush3.msk.msra.mxu1 %vm65_vm1, %v1770_v6 }
  0x9f   :  { %1469 = vmatpush3.bf16.msra.mxu0 %v1843_v25  ;;  %1444 = vmatmul.mubr.msk.f32.vlgmr.msra.gmra.mrb[6].mxu1 %vm61_vm2, %v1284_v46 }
  0xa0   :  { %1470 = vmatprep.subr.bf16.mxu0 %v1704_v7  ;;  %1607 = vmatprep.subr.bf16.mxu1 %v1702_v4 }
  0xa1   :  { %1609 = vmatpush3.bf16.msra.mxu1 %v1762_v5  ;;  %1461 = vmatprep.mubr.msk.f32.mxu1 %vm1703_vm0, %v1704_v7 }
  0xa2   :  { %1459 = vmatprep.subr.mxu1 %v1704_v7 }
  0xa3   :  { %1471 = vmatpush3.bf16.msra.mxu0 %v1856_v27 }
  0xa4   :  { %1488 = vmatprep.subr.bf16.mxu0 %v1704_v7 }
  0xa5   :  { %1460 = vmatpush3.msk.msra.mxu1 %vm65_vm1, %v1770_v6 }
  0xa6   :  { %1462 = vmatmul.mubr.msk.f32.vlgmr.msra.gmra.mrb[8].mxu1 %vm61_vm2, %v1290_v48  ;;  %1476 = vmatprep.subr.bf16.mxu1 %v1704_v7  ;;  %vm1153_vm2 = vcmask 64512  }
  0xa7   :  { %1477 = vmatpush3.bf16.msra.mxu1 %v1829_v22  ;;  %1484 = vmatprep.mubr.msk.bf16.mxu1 %vm1703_vm0, %v1704_v7 }
  0xa8   :  { %1478 = vmatprep.subr.bf16.mxu1 %v1704_v7 }
  0xab   :  { %1479 = vmatpush3.bf16.msra.mxu1 %v1836_v23 }
  0xac   :  { %1480 = vmatprep.subr.bf16.mxu1 %v1704_v7 }
  0xaf   :  { %1481 = vmatpush3.bf16.msra.mxu1 %v1843_v25 }
  0xb0   :  { %1482 = vmatprep.subr.bf16.mxu1 %v1704_v7 }
  0xb3   :  { %1483 = vmatpush3.bf16.msra.mxu1 %v1856_v27 }
  0xb4   :  { %1500 = vmatprep.subr.bf16.mxu1 %v1704_v7 }
 0x157   :  { %v135_v32 = vpop.f32.mrb[0].mxu1 }
 0x158   :  { %v136_v33 = vadd.f32 %v1870_v31, %v135_v32  ;;  %v1400_v34 = vpop.f32.mrb[1].mxu1 }
 0x15a   :  { %1661 = vtanh.f32 %v136_v33 }
 0x15d   :  { %v1873_v35 = vpop.f32.mrb[0].mxu0 }
 0x15e   :  { %v1418_v36 = vpop.f32.mrb[1].mxu0  ;;  %v294_v1 = vadd.f32 %v1870_v31, %v1873_v35 }
 0x163   :  { %v1875_v37 = vpop.f32.mrb[2].mxu0 }
 0x164   :  { %v1436_v38 = vpop.f32.mrb[3].mxu0  ;;  %v1877_v39 = vpop.eup %1661  ;;  %v452_v36 = vadd.f32 %v1870_v31, %v1875_v37 }
 0x165   :  { %v693_v40 = vpack.c.bf16 %v1877_v39, %v1877_v39  ;;  %v1156_v11 = vrot.slane %v1877_v39, 1 }
 0x166   :  { %v214_v49 = vpop.f32.mrb[2].mxu1 }
 0x167   :  { %1473 = vmatmul.mubr.msk.bf16.vlgmr.msra.gmra.mrb[8].mxu0 %vm718_vm8, %v693_v40  ;;  %v1409_v50 = vpop.f32.mrb[3].mxu1  ;;  %v215_v51 = vadd.f32 %v1870_v31, %v214_v49 }
 0x168   :  { %1489 = vmatpush3.bf16.msra.mxu0 %v1829_v22  ;;  %1496 = vmatprep.mubr.msk.bf16.mxu0 %vm1703_vm0, %v1704_v7 }
 0x169   :  { %v1882_v41 = vpop.f32.mrb[4].mxu0  ;;  %1490 = vmatprep.subr.bf16.mxu0 %v1704_v7 }
 0x16a   :  { %v1454_v43 = vpop.f32.mrb[5].mxu0 }
 0x16c   :  { %1491 = vmatpush3.bf16.msra.mxu0 %v1836_v23  ;;  %v372_v57 = vpop.f32.mrb[4].mxu1 }
 0x16d   :  { %1492 = vmatprep.subr.bf16.mxu0 %v1704_v7  ;;  %v1427_v58 = vpop.f32.mrb[5].mxu1  ;;  %v373_v19 = vadd.f32 %v1870_v31, %v372_v57  ;;  %v610_v57 = vadd.f32 %v1870_v31, %v1882_v41  ;;  %v38_v41 = vld [vmem:[%s2048_s4] sm:$0xff] }
 0x170   :  { %1493 = vmatpush3.bf16.msra.mxu0 %v1843_v25 }
 0x171   :  { %1494 = vmatprep.subr.bf16.mxu0 %v1704_v7 }
 0x172   :  { %v1928_v59 = vpop.f32.mrb[6].mxu1 }
 0x173   :  { %v1445_v60 = vpop.f32.mrb[7].mxu1 }
 0x174   :  { %1495 = vmatpush3.bf16.msra.mxu0 %v1856_v27 }
 0x175   :  { %1512 = vmatprep.subr.bf16.mxu0 %v1704_v7 }
 0x179   :  { %v1931_v63 = vpop.f32.mrb[8].mxu1 }
 0x17a   :  { %v1463_v0 = vpop.f32.mrb[9].mxu1 }
 0x23a   :  { %v756_v52 = vpop.f32.mrb[8].mxu0 }
 0x23b   :  { %v762_v53 = vadd.f32 %v756_v52, %v215_v51  ;;  %v1474_v54 = vpop.f32.mrb[9].mxu0 }
 0x23c   :  { %v759_v55 = vpop.f32.mrb[10].mxu0 }
 0x23d   :  { %1663 = vtanh.f32 %v762_v53  ;;  %v1475_v56 = vpop.f32.mrb[11].mxu0 }
 0x247   :  { %v1664_v61 = vpop.eup %1663 }
 0x248   :  { %v764_v62 = vpack.c.bf16 %v1664_v61, %v1664_v61  ;;  %v1041_v9 = vrot.slane %v1664_v61, 7  ;;  %v1170_v16 = vsel %vm1061_vm12, %v1156_v11, %v1664_v61  ;;  %v42_v11 = vld [vmem:[%s2048_s4 + $0x20] sm:$0xff] }
 0x24a   :  { %1485 = vmatmul.mubr.msk.bf16.vlgmr.msra.gmra.mrb[12].mxu1 %vm718_vm8, %v764_v62  ;;  %v1062_v15 = vsel %vm1061_vm12, %v1877_v39, %v1041_v9 }
 0x24b   :  { %1501 = vmatpush3.bf16.msra.mxu1 %v1829_v22  ;;  %1508 = vmatprep.mubr.msk.bf16.mxu1 %vm1703_vm0, %v1704_v7 }
 0x24c   :  { %1502 = vmatprep.subr.bf16.mxu1 %v1704_v7 }
 0x24f   :  { %1503 = vmatpush3.bf16.msra.mxu1 %v1836_v23 }
 0x250   :  { %1504 = vmatprep.subr.bf16.mxu1 %v1704_v7 }
 0x253   :  { %1505 = vmatpush3.bf16.msra.mxu1 %v1843_v25 }
 0x254   :  { %1506 = vmatprep.subr.bf16.mxu1 %v1704_v7 }
 0x257   :  { %1507 = vmatpush3.bf16.msra.mxu1 %v1856_v27 }
 0x258   :  { %1524 = vmatprep.subr.bf16.mxu1 %v1704_v7 }
 0x31d   :  { %v802_v2 = vpop.f32.mrb[12].mxu1 }
 0x31e   :  { %v808_v3 = vadd.f32 %v802_v2, %v294_v1  ;;  %v1486_v5 = vpop.f32.mrb[13].mxu1 }
 0x31f   :  { %v805_v6 = vpop.f32.mrb[14].mxu1 }
 0x320   :  { %1665 = vtanh.f32 %v808_v3  ;;  %v1487_v8 = vpop.f32.mrb[15].mxu1 }
 0x321   :  { %v39_v8 = vld [vmem:[%s2048_s4 + $0x8] sm:$0xff] }
 0x322   :  { %v1611_v9 = vpack.c.bf16 %v39_v8, %v38_v41 }
 0x32a   :  { %v1666_v10 = vpop.eup %1665 }
 0x32b   :  { %v810_v12 = vpack.c.bf16 %v1666_v10, %v1666_v10  ;;  %v1044_v13 = vrot.slane %v1666_v10, 6  ;;  %v1158_v14 = vrot.slane %v1666_v10, 7  ;;  %v40_v10 = vld [vmem:[%s2048_s4 + $0x10] sm:$0xff] }
 0x32d   :  { %1497 = vmatmul.mubr.msk.bf16.vlgmr.msra.gmra.mrb[12].mxu0 %vm718_vm8, %v810_v12  ;;  %v1064_v17 = vsel %vm1063_vm13, %v1062_v15, %v1044_v13  ;;  %v1171_v18 = vsel %vm1063_vm13, %v1170_v16, %v1158_v14  ;;  %v43_v13 = vld [vmem:[%s2048_s4 + $0x28] sm:$0xff]  ;;  %v44_v15 = vld [vmem:[%s2048_s4 + $0x30] sm:$0xff]  ;;  %v45_v16 = vld [vmem:[%s2048_s4 + $0x38] sm:$0xff] }
 0x32e   :  { %1513 = vmatpush3.bf16.msra.mxu0 %v1829_v22  ;;  %1520 = vmatprep.mubr.msk.bf16.mxu0 %vm1703_vm0, %v1704_v7  ;;  %v1617_v14 = vpack.c.bf16 %v43_v13, %v42_v11 }
 0x32f   :  { %1514 = vmatprep.subr.bf16.mxu0 %v1704_v7 }
 0x332   :  { %1515 = vmatpush3.bf16.msra.mxu0 %v1836_v23 }
 0x333   :  { %1516 = vmatprep.subr.bf16.mxu0 %v1704_v7 }
 0x336   :  { %1517 = vmatpush3.bf16.msra.mxu0 %v1843_v25 }
 0x337   :  { %1518 = vmatprep.subr.bf16.mxu0 %v1704_v7 }
 0x33a   :  { %1519 = vmatpush3.bf16.msra.mxu0 %v1856_v27 }
 0x33b   :  { %1536 = vmatprep.subr.bf16.mxu0 %v1704_v7 }
 0x400   :  { %v848_v20 = vpop.f32.mrb[12].mxu0 }
 0x401   :  { %v854_v21 = vadd.f32 %v848_v20, %v373_v19  ;;  %v1498_v24 = vpop.f32.mrb[13].mxu0 }
 0x402   :  { %v851_v26 = vpop.f32.mrb[14].mxu0 }
 0x403   :  { %1667 = vtanh.f32 %v854_v21  ;;  %v1499_v28 = vpop.f32.mrb[15].mxu0 }
 0x40d   :  { %v1668_v29 = vpop.eup %1667 }
 0x40e   :  { %v856_v30 = vpack.c.bf16 %v1668_v29, %v1668_v29  ;;  %v1047_v32 = vrot.slane %v1668_v29, 5  ;;  %v1160_v33 = vrot.slane %v1668_v29, 6 }
 0x410   :  { %1509 = vmatmul.mubr.msk.bf16.vlgmr.msra.gmra.mrb[16].mxu1 %vm718_vm8, %v856_v30  ;;  %v1066_v34 = vsel %vm1065_vm14, %v1064_v17, %v1047_v32  ;;  %v1172_v35 = vsel %vm1065_vm14, %v1171_v18, %v1160_v33  ;;  %v1620_v17 = vpack.c.bf16 %v45_v16, %v44_v15  ;;  %v689_v18 = vadd.f32 %v1870_v31, %v1931_v63 }
 0x411   :  { %1525 = vmatpush3.bf16.msra.mxu1 %v1829_v22  ;;  %1532 = vmatprep.mubr.msk.bf16.mxu1 %vm1703_vm0, %v1704_v7 }
 0x412   :  { %1526 = vmatprep.subr.bf16.mxu1 %v1704_v7 }
 0x415   :  { %1527 = vmatpush3.bf16.msra.mxu1 %v1836_v23 }
 0x416   :  { %1528 = vmatprep.subr.bf16.mxu1 %v1704_v7 }
 0x419   :  { %1529 = vmatpush3.bf16.msra.mxu1 %v1843_v25 }
 0x41a   :  { %1530 = vmatprep.subr.bf16.mxu1 %v1704_v7 }
 0x41d   :  { %1531 = vmatpush3.bf16.msra.mxu1 %v1856_v27 }
 0x41e   :  { %1610 = vmatprep.subr.bf16.mxu1 %v1702_v4 }
 0x4e3   :  { %v894_v38 = vpop.f32.mrb[16].mxu1 }
 0x4e4   :  { %v900_v39 = vadd.f32 %v894_v38, %v452_v36  ;;  %v1510_v40 = vpop.f32.mrb[17].mxu1 }
 0x4e5   :  { %v897_v42 = vpop.f32.mrb[18].mxu1 }
 0x4e6   :  { %1669 = vtanh.f32 %v900_v39  ;;  %v1511_v43 = vpop.f32.mrb[19].mxu1 }
 0x4f0   :  { %v1670_v44 = vpop.eup %1669 }
 0x4f1   :  { %v902_v45 = vpack.c.bf16 %v1670_v44, %v1670_v44  ;;  %v1050_v46 = vrot.slane %v1670_v44, 4  ;;  %v1162_v47 = vrot.slane %v1670_v44, 5 }
 0x4f3   :  { %1521 = vmatmul.mubr.msk.bf16.vlgmr.msra.gmra.mrb[16].mxu0 %vm718_vm8, %v902_v45  ;;  %v1067_v48 = vsel %vm65_vm1, %v1066_v34, %v1050_v46  ;;  %v1173_v49 = vsel %vm65_vm1, %v1172_v35, %v1162_v47  ;;  %vm1070_vm1 = vcmask 1045504  }
 0x4f4   :  { %1537 = vmatpush3.bf16.msra.mxu0 %v1829_v22  ;;  %1544 = vmatprep.mubr.msk.bf16.mxu0 %vm1703_vm0, %v1704_v7  ;;  %v531_v22 = vadd.f32 %v1870_v31, %v1928_v59 }
 0x4f5   :  { %1538 = vmatprep.subr.bf16.mxu0 %v1704_v7 }
 0x4f8   :  { %1539 = vmatpush3.bf16.msra.mxu0 %v1836_v23 }
 0x4f9   :  { %1540 = vmatprep.subr.bf16.mxu0 %v1704_v7 }
 0x4fc   :  { %1541 = vmatpush3.bf16.msra.mxu0 %v1843_v25 }
 0x4fd   :  { %1542 = vmatprep.subr.bf16.mxu0 %v1704_v7 }
 0x500   :  { %1543 = vmatpush3.bf16.msra.mxu0 %v1856_v27 }
 0x501   :  { %1622 = vmatprep.subr.bf16.mxu0 %v1702_v4 }
 0x5c6   :  { %v940_v37 = vpop.f32.mrb[16].mxu0 }
 0x5c7   :  { %v946_v50 = vadd.f32 %v940_v37, %v531_v22  ;;  %v1522_v51 = vpop.f32.mrb[17].mxu0 }
 0x5c8   :  { %v943_v52 = vpop.f32.mrb[18].mxu0 }
 0x5c9   :  { %1671 = vtanh.f32 %v946_v50  ;;  %v1523_v53 = vpop.f32.mrb[19].mxu0 }
 0x5d3   :  { %v1672_v23 = vpop.eup %1671 }
 0x5d4   :  { %v948_v54 = vpack.c.bf16 %v1672_v23, %v1672_v23  ;;  %v1053_v55 = vrot.slane %v1672_v23, 3  ;;  %v1164_v25 = vrot.slane %v1672_v23, 4 }
 0x5d6   :  { %1533 = vmatmul.mubr.msk.bf16.vlgmr.msra.gmra.mrb[20].mxu1 %vm718_vm8, %v948_v54  ;;  %v1069_v56 = vsel %vm1068_vm15, %v1067_v48, %v1053_v55  ;;  %v1174_v27 = vsel %vm1068_vm15, %v1173_v49, %v1164_v25 }
 0x5d7   :  { %1564 = vmatprep.mubr.msk.f32.mxu1 %vm1703_vm0, %v1704_v7  ;;  %1612 = vmatpush3.bf16.msra.mxu1 %v1611_v9 }
 0x5d8   :  { %1613 = vmatprep.subr.bf16.mxu1 %v1702_v4 }
 0x6a9   :  { %v986_v58 = vpop.f32.mrb[20].mxu1 }
 0x6aa   :  { %v992_v59 = vadd.f32 %v986_v58, %v610_v57  ;;  %v1534_v60 = vpop.f32.mrb[21].mxu1 }
 0x6ab   :  { %v989_v61 = vpop.f32.mrb[22].mxu1 }
 0x6ac   :  { %1673 = vtanh.f32 %v992_v59  ;;  %v1535_v62 = vpop.f32.mrb[23].mxu1 }
 0x6b6   :  { %v1674_v0 = vpop.eup %1673 }
 0x6b7   :  { %v994_v1 = vpack.c.bf16 %v1674_v0, %v1674_v0  ;;  %v1056_v2 = vrot.slane %v1674_v0, 2  ;;  %v1166_v3 = vrot.slane %v1674_v0, 3 }
 0x6b9   :  { %1545 = vmatmul.mubr.msk.bf16.vlgmr.msra.gmra.mrb[20].mxu0 %vm718_vm8, %v994_v1  ;;  %v1071_v5 = vsel %vm1070_vm1, %v1069_v56, %v1056_v2  ;;  %v1175_v6 = vsel %vm1070_vm1, %v1174_v27, %v1166_v3 }
 0x6ba   :  { %1583 = vmatprep.mubr.msk.f32.mxu0 %vm1703_vm0, %v1704_v7  ;;  %1624 = vmatpush3.bf16.msra.mxu0 %v1611_v9  ;;  %v41_v7 = vld [vmem:[%s2048_s4 + $0x18] sm:$0xff]  ;;  %vm1072_vm0 = vcmask 1046528   ;;  %s1712_s4 = smov [#allocation2]  }
 0x6bb   :  { %1625 = vmatprep.subr.bf16.mxu0 %v1702_v4  ;;  %v1614_v12 = vpack.c.bf16 %v41_v7, %v40_v10  ;;  %s1257_s0 = sshll.u32 %s1712_s4, 4  ;;  %s1258_s0 = int_to_ptr.vmem [resolvable:$true] %s1257_s0 }
 0x6bc   :  { %s1677_s28 = scalar_lea.vmem %s1258_s0, 256  ;;  %p1682_p1 = scmp.lt.s32.totalorder %s1258_s0, %s1258_s0 }
 0x6bd   :  { %1615 = vmatpush3.bf16.msra.mxu1 %v1614_v12  ;;  %p1678_p0 = scmp.ne.s32.totalorder %s1258_s0, %s1677_s28  ;;  %p1683_p2 = scmp.lt.s32.totalorder %s1677_s28, %s1677_s28 }
 0x6be   :  { %1627 = vmatpush3.bf16.msra.mxu0 %v1614_v12  ;;  %1616 = vmatprep.subr.bf16.mxu1 %v1702_v4 }
 0x6bf   :  { %1628 = vmatprep.subr.bf16.mxu0 %v1702_v4  ;;  %p1684_p3 = por %p1683_p2, %p1682_p1 }
 0x6c1   :  { %1618 = vmatpush3.bf16.msra.mxu1 %v1617_v14  ;;  %p1685_p4 = pnand %p1684_p3, %p1678_p0 }
 0x6c2   :  { %1630 = vmatpush3.bf16.msra.mxu0 %v1617_v14  ;;  %1619 = vmatprep.subr.bf16.mxu1 %v1702_v4 }
 0x6c3   :  { %1631 = vmatprep.subr.bf16.mxu0 %v1702_v4  ;;  %v1304_v4 = vld [vmem:[%s2049_s5] ss:$0 sm:$0xff] }
 0x6c5   :  { %1621 = vmatpush3.bf16.msra.mxu1 %v1620_v17 }
 0x6c6   :  { %1633 = vmatpush3.bf16.msra.mxu0 %v1620_v17 }
 0x78c   :  { %v1032_v19 = vpop.f32.mrb[20].mxu0 }
 0x78d   :  { %v1038_v20 = vadd.f32 %v1032_v19, %v689_v18  ;;  %v1546_v21 = vpop.f32.mrb[21].mxu0 }
 0x78e   :  { %v1035_v24 = vpop.f32.mrb[22].mxu0 }
 0x78f   :  { %1675 = vtanh.f32 %v1038_v20  ;;  %v1547_v26 = vpop.f32.mrb[23].mxu0 }
 0x799   :  { %v1676_v28 = vpop.eup %1675 }
 0x79a   :  { %v1059_v29 = vrot.slane %v1676_v28, 1  ;;  %v1168_v30 = vrot.slane %v1676_v28, 2 }
 0x79c   :  { %v1073_v32 = vsel %vm1072_vm0, %v1071_v5, %v1059_v29  ;;  %v1176_v33 = vsel %vm1072_vm0, %v1175_v6, %v1168_v30 }
 0x79d   :  { %1565 = vmatmul.mubr.msk.f32.vlgmr.msra.gmra.mrb[10].mxu1 %vm718_vm8, %v1073_v32  ;;  %1584 = vmatmul.mubr.msk.f32.vlgmr.msra.gmra.mrb[6].mxu0 %vm718_vm8, %v1176_v33 }
 0x870   :  { %v1149_v31 = vpop.f32.mrb[10].mxu1  ;;  %v1246_v63 = vpop.f32.mrb[6].mxu0 }
 0x871   :  { %v1150_v34 = vadd.f32 %v1304_v4, %v1149_v31  ;;  %v1247_v35 = vadd.f32 %v1304_v4, %v1246_v63  ;;  %v1566_v36 = vpop.f32.mrb[11].mxu1  ;;  %v1585_v38 = vpop.f32.mrb[7].mxu0 }
 0x873   :  { %1154 = vst.msk [vmem:[#allocation2] sm:$0xff] %vm1153_vm2, %v1150_v34  ;;  %1251 = vst.msk [vmem:[#allocation2 + $0x8] sm:$0xff] %vm1153_vm2, %v1247_v35 }
 0x874   :  { %1688 = shalt.err (!%p1685_p4)
}
 0x875   :  { %s1689_s5 = scalar_lea.hbm %s2050_s6, 256 }
 0x876   :  { %p1690_p5 = scmp.ne.s32.totalorder %s2050_s6, %s1689_s5  ;;  %p1693_p6 = scmp.lt.u32.totalorder %s1689_s5, %s2050_s6 }
 0x878   :  { %p1695_p7 = pnand %p1693_p6, %p1690_p5 }
 0x87a   :  { %1698 = shalt.err (!%p1695_p7)
}
 0x87b   :  { %s1713_s2 = smov 128   ;;  %s1714_s11 = smov 8  }
 0x87c   :  { %1263 = dma.vmem_to_hbm [thread:$0]  %s1258_s0, 256, %s2050_s6, [#allocation3], %s1713_s2, %s1713_s2, %s1714_s11  }
 0x87d   :  { %1699 = dma.done.wait [#allocation3], 256  }
 0x87e   :  { %1700 = vsyncadd [#allocation3], 4294967040 }
 0x87f   :  { %1267 = vsyncpa [#allocation3], 1 }

</bundles_post_ra>
